<compile_context>
chip_gen: v7x
topology: tpu7x:2x2x1
jax: 0.10.0
libtpu: 0.0.40
codegen_flags: <defaults>
</compile_context>

<pallas_src>
import functools

import numpy as np
import jax
import jax.numpy as jnp
from jax.experimental import pallas as pl
from jax.experimental.pallas import tpu as pltpu


def _conv2d_kernel(x_ref, w_ref, b_ref, o_ref, *, kh_taps, h_out):
    # x_ref: (H_p, W_p*C_in)           padded input slab for one image
    # w_ref: (KH, W_p*C_in, W_out*C_out)  banded weights (resident across steps)
    # b_ref: (1, W_out*C_out)          bias row, already tiled over W_out
    # o_ref: (H_out, W_out*C_out)      output slab for one image
    acc = jnp.zeros(o_ref.shape, jnp.float32)
    for kh in range(kh_taps):  # KH static taps -> KH MXU matmuls
        acc = acc + jnp.dot(
            x_ref[kh:kh + h_out, :], w_ref[kh],
            preferred_element_type=jnp.float32,
        )
    o_ref[...] = (acc + b_ref[...]).astype(o_ref.dtype)


def conv2d_pallas(x, weight, bias, *, stride=1, padding=1):
    """x: (N, C_in, H, W); weight: (C_out, C_in, KH, KW); bias: (C_out,)."""
    if stride != 1:
        # TODO(synk): general stride needs strided row slices (pl.ds stride) +
        # stride-aware band construction; not required by this module's default.
        raise NotImplementedError("conv2d_pallas currently supports stride=1 only")

    N, C_in, H, W = x.shape
    C_out, C_in_w, KH, KW = weight.shape
    assert C_in_w == C_in
    pad = int(padding)
    H_p, W_p = H + 2 * pad, W + 2 * pad
    H_out = H_p - KH + 1
    W_out = W_p - KW + 1
    assert H_out > 0 and W_out > 0, "output spatial dims must be positive"

    dtype = x.dtype

    # ---- wrapper-side layout plumbing (cheap, done once per call) ----
    # NCHW -> NHWC, zero-pad spatially, flatten (W_p, C_in) into the lane axis.
    x_nhwc = jnp.transpose(x, (0, 2, 3, 1))
    x_pad = jnp.pad(x_nhwc, ((0, 0), (pad, pad), (pad, pad), (0, 0)))
    x2 = x_pad.reshape(N, H_p, W_p * C_in)  # contiguous trailing dims: free

    # OIHW -> HWIO, then scatter into per-kh width-banded (block-Toeplitz) form:
    #   wband[kh, (wo + kw)*C_in + ci, wo*C_out + co] = weight[co, ci, kh, kw]
    w_hwio = jnp.transpose(weight, (2, 3, 1, 0)).astype(dtype)  # (KH, KW, C_in, C_out)
    wo_i = np.arange(W_out)[:, None, None, None]
    kw_i = np.arange(KW)[None, :, None, None]
    ci_i = np.arange(C_in)[None, None, :, None]
    co_i = np.arange(C_out)[None, None, None, :]
    row_idx = np.broadcast_to((wo_i + kw_i) * C_in + ci_i, (W_out, KW, C_in, C_out))
    col_idx = np.broadcast_to(wo_i * C_out + co_i, (W_out, KW, C_in, C_out))
    vals = jnp.broadcast_to(w_hwio[:, None, :, :, :], (KH, W_out, KW, C_in, C_out))
    wband = jnp.zeros((KH, W_p * C_in, W_out * C_out), dtype=dtype)
    wband = wband.at[:, row_idx, col_idx].set(vals)

    b_row = jnp.tile(bias.astype(dtype), W_out)[None, :]  # (1, W_out*C_out)

    WpC = W_p * C_in
    WoC = W_out * C_out

    kernel = functools.partial(_conv2d_kernel, kh_taps=KH, h_out=H_out)

    out2 = pl.pallas_call(
        kernel,
        out_shape=jax.ShapeDtypeStruct((N, H_out, WoC), dtype),
        grid=(N,),
        in_specs=[
            # one padded image per grid step (batch dim squeezed out)
            pl.BlockSpec((None, H_p, WpC), lambda n: (n, 0, 0)),
            # banded weights: constant block index -> stays resident in VMEM
            pl.BlockSpec((KH, WpC, WoC), lambda n: (0, 0, 0)),
            pl.BlockSpec((1, WoC), lambda n: (0, 0)),
        ],
        out_specs=pl.BlockSpec((None, H_out, WoC), lambda n: (n, 0, 0)),
        compiler_params=pltpu.CompilerParams(
            dimension_semantics=("parallel",),  # megacore sharding over batch
        ),
    )(x2, wband, b_row)

    # (N, H_out, W_out*C_out) -> (N, C_out, H_out, W_out)
    return jnp.transpose(out2.reshape(N, H_out, W_out, C_out), (0, 3, 1, 2))


class Conv2d:
    """Mirror of the PyTorch module: y = nn.Conv2d(nch_in, nch_out, k, s, p, bias)(x)."""

    def __init__(self, nch_in, nch_out, kernel_size=4, stride=1, padding=1,
                 bias=True, *, key=None, dtype=jnp.float32):
        self.nch_in = int(nch_in)
        self.nch_out = int(nch_out)
        self.kernel_size = int(kernel_size)
        self.stride = int(stride)
        self.padding = int(padding)

        if key is None:
            key = jax.random.PRNGKey(0)
        kw, kb = jax.random.split(key)
        fan_in = self.nch_in * self.kernel_size * self.kernel_size
        bound = 1.0 / float(np.sqrt(fan_in))
        # PyTorch-style uniform init (deterministic given `key`)
        self.weight = jax.random.uniform(
            kw, (self.nch_out, self.nch_in, self.kernel_size, self.kernel_size),
            dtype=dtype, minval=-bound, maxval=bound)
        if bias:
            self.bias = jax.random.uniform(
                kb, (self.nch_out,), dtype=dtype, minval=-bound, maxval=bound)
        else:
            self.bias = jnp.zeros((self.nch_out,), dtype=dtype)

    def __call__(self, x: jax.Array) -> jax.Array:
        return conv2d_pallas(x, self.weight, self.bias,
                             stride=self.stride, padding=self.padding)


if __name__ == "__main__":
    key = jax.random.PRNGKey(0)
    kx, kmod = jax.random.split(key)

    N, C_in, H, W = 2, 4, 16, 16
    C_out = 8
    x = jax.random.normal(kx, (N, C_in, H, W), dtype=jnp.float32)

    conv = Conv2d(C_in, C_out, kernel_size=4, stride=1, padding=1, bias=True, key=kmod)
    y = jax.block_until_ready(conv(x))

    # Reference: XLA conv with identical (PyTorch) semantics.
    ref = jax.lax.conv_general_dilated(
        x, conv.weight, window_strides=(1, 1),
        padding=((1, 1), (1, 1)),
        dimension_numbers=("NCHW", "OIHW", "NCHW"),
        precision=jax.lax.Precision.HIGHEST,
    ) + conv.bias.reshape(1, -1, 1, 1)

    assert y.shape == (N, C_out, 15, 15), y.shape
    max_err = float(jnp.max(jnp.abs(y - ref)))
    assert jnp.allclose(y, ref, atol=1e-3, rtol=1e-3), f"max abs err = {max_err}"

    print("KERNEL_OK")
</pallas_src>

<mosaic_0001>
module attributes {stable_mosaic.version = 11 : i64} {
  func.func @_conv2d_kernel(%arg0: i32, %arg1: memref<1x18x72xf32, #tpu.memory_space<vmem>>, %arg2: memref<4x72x120xf32, #tpu.memory_space<vmem>>, %arg3: memref<1x120xf32, #tpu.memory_space<vmem>>, %arg4: memref<1x15x120xf32, #tpu.memory_space<vmem>>) attributes {dimension_semantics = [#tpu.dimension_semantics<parallel>], iteration_bounds = array<i64: 2>, scalar_prefetch = 0 : i64, scratch_operands = 0 : i64, tpu.core_type = #tpu.core_type<tc>, window_params = [{transform_indices = @transform_0, window_bounds = array<i64: 1, 18, 72>}, {pipeline_mode = #tpu.pipeline_mode<synchronous>, transform_indices = @transform_1, window_bounds = array<i64: 4, 72, 120>}, {pipeline_mode = #tpu.pipeline_mode<synchronous>, transform_indices = @transform_2, window_bounds = array<i64: 1, 120>}, {transform_indices = @transform_3, window_bounds = array<i64: 1, 15, 120>}]} {
    %cst = arith.constant 0.000000e+00 : f32
    %0 = vector.broadcast %cst : f32 to vector<15x120xf32>
    %c0 = arith.constant 0 : index
    %c0_0 = arith.constant 0 : index
    %c0_1 = arith.constant 0 : index
    %1 = vector.load %arg1[%c0, %c0_0, %c0_1] : memref<1x18x72xf32, #tpu.memory_space<vmem>>, vector<1x15x72xf32>
    %2 = vector.shape_cast %1 : vector<1x15x72xf32> to vector<15x72xf32>
    %c0_2 = arith.constant 0 : index
    %c0_3 = arith.constant 0 : index
    %c0_4 = arith.constant 0 : index
    %3 = vector.load %arg2[%c0_2, %c0_3, %c0_4] : memref<4x72x120xf32, #tpu.memory_space<vmem>>, vector<1x72x120xf32>
    %4 = vector.shape_cast %3 : vector<1x72x120xf32> to vector<72x120xf32>
    %cst_5 = arith.constant dense<0.000000e+00> : vector<15x120xf32>
    %5 = tpu.matmul %2, %4, %cst_5 {dimension_numbers = #tpu.dot_dimension_numbers<[1], [0], [0], [1], [0, 0, 1, 1], [], []>} : vector<15x72xf32>, vector<72x120xf32>, vector<15x120xf32> -> vector<15x120xf32>
    %6 = arith.addf %0, %5 : vector<15x120xf32>
    %c0_6 = arith.constant 0 : index
    %c1 = arith.constant 1 : index
    %c0_7 = arith.constant 0 : index
    %7 = vector.load %arg1[%c0_6, %c1, %c0_7] : memref<1x18x72xf32, #tpu.memory_space<vmem>>, vector<1x15x72xf32>
    %8 = vector.shape_cast %7 : vector<1x15x72xf32> to vector<15x72xf32>
    %c1_8 = arith.constant 1 : index
    %c0_9 = arith.constant 0 : index
    %c0_10 = arith.constant 0 : index
    %9 = vector.load %arg2[%c1_8, %c0_9, %c0_10] : memref<4x72x120xf32, #tpu.memory_space<vmem>>, vector<1x72x120xf32>
    %10 = vector.shape_cast %9 : vector<1x72x120xf32> to vector<72x120xf32>
    %cst_11 = arith.constant dense<0.000000e+00> : vector<15x120xf32>
    %11 = tpu.matmul %8, %10, %cst_11 {dimension_numbers = #tpu.dot_dimension_numbers<[1], [0], [0], [1], [0, 0, 1, 1], [], []>} : vector<15x72xf32>, vector<72x120xf32>, vector<15x120xf32> -> vector<15x120xf32>
    %12 = arith.addf %6, %11 : vector<15x120xf32>
    %c0_12 = arith.constant 0 : index
    %c2 = arith.constant 2 : index
    %c0_13 = arith.constant 0 : index
    %13 = vector.load %arg1[%c0_12, %c2, %c0_13] : memref<1x18x72xf32, #tpu.memory_space<vmem>>, vector<1x15x72xf32>
    %14 = vector.shape_cast %13 : vector<1x15x72xf32> to vector<15x72xf32>
    %c2_14 = arith.constant 2 : index
    %c0_15 = arith.constant 0 : index
    %c0_16 = arith.constant 0 : index
    %15 = vector.load %arg2[%c2_14, %c0_15, %c0_16] : memref<4x72x120xf32, #tpu.memory_space<vmem>>, vector<1x72x120xf32>
    %16 = vector.shape_cast %15 : vector<1x72x120xf32> to vector<72x120xf32>
    %cst_17 = arith.constant dense<0.000000e+00> : vector<15x120xf32>
    %17 = tpu.matmul %14, %16, %cst_17 {dimension_numbers = #tpu.dot_dimension_numbers<[1], [0], [0], [1], [0, 0, 1, 1], [], []>} : vector<15x72xf32>, vector<72x120xf32>, vector<15x120xf32> -> vector<15x120xf32>
    %18 = arith.addf %12, %17 : vector<15x120xf32>
    %c0_18 = arith.constant 0 : index
    %c3 = arith.constant 3 : index
    %c0_19 = arith.constant 0 : index
    %19 = vector.load %arg1[%c0_18, %c3, %c0_19] : memref<1x18x72xf32, #tpu.memory_space<vmem>>, vector<1x15x72xf32>
    %20 = vector.shape_cast %19 : vector<1x15x72xf32> to vector<15x72xf32>
    %c3_20 = arith.constant 3 : index
    %c0_21 = arith.constant 0 : index
    %c0_22 = arith.constant 0 : index
    %21 = vector.load %arg2[%c3_20, %c0_21, %c0_22] : memref<4x72x120xf32, #tpu.memory_space<vmem>>, vector<1x72x120xf32>
    %22 = vector.shape_cast %21 : vector<1x72x120xf32> to vector<72x120xf32>
    %cst_23 = arith.constant dense<0.000000e+00> : vector<15x120xf32>
    %23 = tpu.matmul %20, %22, %cst_23 {dimension_numbers = #tpu.dot_dimension_numbers<[1], [0], [0], [1], [0, 0, 1, 1], [], []>} : vector<15x72xf32>, vector<72x120xf32>, vector<15x120xf32> -> vector<15x120xf32>
    %24 = arith.addf %18, %23 : vector<15x120xf32>
    %c0_24 = arith.constant 0 : index
    %c0_25 = arith.constant 0 : index
    %25 = vector.load %arg3[%c0_24, %c0_25] : memref<1x120xf32, #tpu.memory_space<vmem>>, vector<1x120xf32>
    %26 = vector.broadcast %25 : vector<1x120xf32> to vector<15x120xf32>
    %27 = arith.addf %24, %26 : vector<15x120xf32>
    %c0_26 = arith.constant 0 : index
    %c0_27 = arith.constant 0 : index
    %c0_28 = arith.constant 0 : index
    %28 = vector.load %arg4[%c0_26, %c0_27, %c0_28] : memref<1x15x120xf32, #tpu.memory_space<vmem>>, vector<1x15x120xf32>
    %29 = vector.shape_cast %28 : vector<1x15x120xf32> to vector<15x120xf32>
    %30 = vector.shape_cast %27 : vector<15x120xf32> to vector<1x15x120xf32>
    tpu.vector_store %arg4[%c0_26, %c0_27, %c0_28], %30 {strides = array<i32>} : memref<1x15x120xf32, #tpu.memory_space<vmem>>, vector<1x15x120xf32>,
    return
  }
  func.func @transform_0(%arg0: i32) -> (i32, i32, i32) {
    %c0_i32 = arith.constant 0 : i32
    %c0_i32_0 = arith.constant 0 : i32
    %c0_i32_1 = arith.constant 0 : i32
    return %arg0, %c0_i32, %c0_i32_0 : i32, i32, i32
  }
  func.func @transform_1(%arg0: i32) -> (i32, i32, i32) {
    %c0_i32 = arith.constant 0 : i32
    %c0_i32_0 = arith.constant 0 : i32
    %c0_i32_1 = arith.constant 0 : i32
    %c0_i32_2 = arith.constant 0 : i32
    return %c0_i32, %c0_i32_0, %c0_i32_1 : i32, i32, i32
  }
  func.func @transform_2(%arg0: i32) -> (i32, i32) {
    %c0_i32 = arith.constant 0 : i32
    %c0_i32_0 = arith.constant 0 : i32
    %c0_i32_1 = arith.constant 0 : i32
    return %c0_i32, %c0_i32_0 : i32, i32
  }
  func.func @transform_3(%arg0: i32) -> (i32, i32, i32) {
    %c0_i32 = arith.constant 0 : i32
    %c0_i32_0 = arith.constant 0 : i32
    %c0_i32_1 = arith.constant 0 : i32
    return %arg0, %c0_i32, %c0_i32_0 : i32, i32, i32
  }
}

</mosaic_0001>

<bundles_post_ra>
// kernel: tpu_custom_call.1
= control target key start
LH: loop header
LB: loop body
LE: loop exit
PB: predicated region body
PF: predicated region fallthrough
CT: control target
= control target key end

     0   :  { %8 = vsyncpa [#allocation3], 0  ;;  %s947_s12 = smov 0   ;;  %s1028_s0 = inlined_call_operand.vmem [shape: f32[2,18,72], index: 0, kind: input, shape index: {}]   ;;  %s1029_s1 = inlined_call_operand.hbm [shape: f32[4,72,120], index: 1, kind: input, shape index: {}]   ;;  %s1030_s2 = inlined_call_operand.vmem [shape: f32[1,120], index: 2, kind: input, shape index: {}]   ;;  %s1031_s3 = inlined_call_operand.vmem [shape: f32[2,15,120], index: 3, kind: output, shape index: {}]  }
   0x1 LB: > { %s953_s13 = sadd.s32 4294967295, %s922_s12   ;;  %p644_p0 = scmp.ge.s32.totalorder %s922_s12, 1  ;;  %s922_s12 = sphi %s947_s12, %s14_s12  }
   0x2   : > { %p113_p1 = scmp.lt.s32.totalorder %s922_s12, 3  ;;  %s924_s14 = smov [#allocation2]  }
   0x3   : > { %s125_s15 = sshll.u32 %s924_s14, 4  ;;  %p1032_p3 = scmp.eq.s32.totalorder %s953_s13, 0  ;;  %s126_s15 = int_to_ptr.vmem [resolvable:$true] %s125_s15 }
   0x4   : > { %p957_p2 = pnand %p644_p0, %p113_p1  ;;  %s884_s20 = scalar_lea.hbm %s1029_s1, 4608 }
   0x5   : > { %p885_p6 = scmp.ne.s32.totalorder %s1029_s1, %s884_s20  ;;  %p891_p10 = scmp.lt.u32.totalorder %s884_s20, %s1029_s1 }
   0x6   : > { %s1034_s16 = scalar_select %p957_p2, 1, 0 }
   0x7   : > { %p867_p4 = pneg %p957_p2 }
   0x9   : > { %p966_p5 = pnand %p1032_p3, %p867_p4 }
   0xb   : > { %p886_p7 = pneg %p966_p5 }
   0xd   : > { %p887_p8 = pnand %p886_p7, %p885_p6 }
   0xf   : > { %p888_p9 = pneg %p887_p8 }
  0x11   : > { %p893_p11 = pnand %p891_p10, %p888_p9 }
  0x13   : > { %896 = shalt.err (!%p893_p11)
}
  0x14   : > { %s897_s25 = scalar_lea.vmem %s126_s15, 4608  ;;  %p905_p1 = scmp.lt.s32.totalorder %s126_s15, %s126_s15 }
  0x15   : > { %p898_p12 = scmp.ne.s32.totalorder %s126_s15, %s897_s25  ;;  %p906_p4 = scmp.lt.s32.totalorder %s897_s25, %s897_s25 }
  0x17   : > { %p900_p13 = pnand %p898_p12, %p886_p7  ;;  %p907_p3 = por %p906_p4, %p905_p1 }
  0x19   : > { %p901_p0 = pneg %p900_p13 }
  0x1b   : > { %p908_p2 = pnand %p907_p3, %p901_p0 }
  0x1d   : > { %911 = shalt.err (!%p908_p2)
}
  0x1e   : > { %s925_s26 = smov 128   ;;  %s926_s27 = smov 8  }
  0x1f   : > { %870 = dma.hbm_to_vmem [thread:$0]  (!%p966_p5), %s1029_s1, 4608, %s126_s15, [#allocation3], %s925_s26, %s925_s26, %s926_s27  }
  0x20   : > { %p1036_p6 = scmp.ne.s32.totalorder %s1034_s16, 0 }
  0x21   : > { %p1037_p8 = scmp.eq.s32.totalorder (!%p1036_p6), %s953_s13, 0 }
  0x22   : > { %152 = sbr.rel (%p1036_p6) target bundleno = 301 (0x12d), region = 32 }
  0x29   : > { %917 = dma.done.wait (%p1037_p8), [#allocation3], 4608   ;;  %p1038_p7 = pmov %p1037_p8 }
  0x2a   : > { %p176_p2 = scmp.lt.s32.totalorder %s953_s13, 1  ;;  %v200_v0 = vld [vmem:[#allocation2 + $0x48] sm:$0xff]  ;;  %v201_v1 = vld [vmem:[#allocation2 + $0x50] sm:$0xff]  ;;  %v376_v4 = vld [vmem:[#allocation2 + $0x98] sm:$0xff]  ;;  %vm209_vm0 = vcmask 588800   ;;  %vm573_vm1 = vcmask 980992  }
  0x2b   : > { %919 = vsyncadd (%p1038_p7), [#allocation3], 4294962688  ;;  %v375_v2 = vld [vmem:[#allocation2 + $0x90] sm:$0xff]  ;;  %v792_v3 = vpack.c.bf16 %v201_v1, %v200_v0  ;;  %v202_v5 = vld [vmem:[#allocation2 + $0x58] sm:$0xff]  ;;  %vm571_vm2 = vcmask 982016  }
  0x2c   : > { %s1040_s13 = smov (!%p176_p2, %s953_s13), 1  ;;  %v203_v6 = vld [vmem:[#allocation2 + $0x60] sm:$0xff]  ;;  %v824_v7 = vpack.c.bf16 %v376_v4, %v375_v2  ;;  %v378_v10 = vld [vmem:[#allocation2 + $0xa8] sm:$0xff]  ;;  %v205_v13 = vld [vmem:[#allocation2 + $0x70] sm:$0xff] }
  0x2d   : > { %s862_s30 = smul.u32 24, %s1040_s13  ;;  %v796_v8 = vpack.c.bf16 %v203_v6, %v202_v5  ;;  %v377_v9 = vld [vmem:[#allocation2 + $0xa0] sm:$0xff]  ;;  %v204_v11 = vld [vmem:[#allocation2 + $0x68] sm:$0xff]  ;;  %793 = vmatprep.subr.bf16.mxu1 %v792_v3  ;;  %v379_v14 = vld [vmem:[#allocation2 + $0xb0] sm:$0xff]  ;;  %s663_s7 = sshll.u32 %s1040_s13, 4 }
  0x2e   : > { %v828_v12 = vpack.c.bf16 %v378_v10, %v377_v9  ;;  %v380_v15 = vld [vmem:[#allocation2 + $0xb8] sm:$0xff]  ;;  %825 = vmatprep.subr.bf16.mxu0 %v824_v7  ;;  %795 = vmatpush3.bf16.msra.mxu1 %v792_v3  ;;  %v800_v16 = vpack.c.bf16 %v205_v13, %v204_v11  ;;  %v207_v19 = vld [vmem:[#allocation2 + $0x80] sm:$0xff]  ;;  %v382_v22 = vld [vmem:[#allocation2 + $0xc8] sm:$0xff]  ;;  %s185_s14 = scalar_lea.vmem %s1031_s3, %s663_s7 }
  0x2f   : > { %s1000_s6 = scalar_lea.vmem %s1028_s0, %s862_s30  ;;  %827 = vmatpush3.bf16.msra.mxu0 %v824_v7  ;;  %797 = vmatprep.subr.bf16.mxu1 %v796_v8  ;;  %v832_v17 = vpack.c.bf16 %v380_v15, %v379_v14  ;;  %v206_v18 = vld [vmem:[#allocation2 + $0x78] sm:$0xff]  ;;  %v381_v21 = vld [vmem:[#allocation2 + $0xc0] sm:$0xff]  ;;  %v208_v26 = vld [vmem:[#allocation2 + $0x88] sm:$0xff] }
  0x30   : > { %829 = vmatprep.subr.bf16.mxu0 %v828_v12  ;;  %v197_v20 = vld [vmem:[%s1000_s6 + $0x1] sm:$0xff]  ;;  %v804_v24 = vpack.c.bf16 %v207_v19, %v206_v18  ;;  %v836_v25 = vpack.c.bf16 %v382_v22, %v381_v21  ;;  %v383_v29 = vld [vmem:[#allocation2 + $0xd0] sm:$0xff]  ;;  %v470_v30 = vld [vmem:[#allocation2 + $0xd8] sm:$0xff] }
  0x31   : > { %726 = vmatprep.mubr.msk.f32.mxu1 %vm209_vm0, %v197_v20  ;;  %v372_v23 = vld [vmem:[%s1000_s6 + $0x2] sm:$0xff]  ;;  %v190_v33 = vld [vmem:[#allocation2 + $0x10] sm:$0xff]  ;;  %v191_v34 = vld [vmem:[#allocation2 + $0x18] sm:$0xff] }
  0x32   : > { %799 = vmatpush3.bf16.msra.mxu1 %v796_v8  ;;  %768 = vmatprep.mubr.msk.f32.mxu0 %vm209_vm0, %v372_v23  ;;  %v188_v27 = vld [vmem:[#allocation2] sm:$0xff]  ;;  %v189_v28 = vld [vmem:[#allocation2 + $0x8] sm:$0xff]  ;;  %v473_v37 = vld [vmem:[#allocation2 + $0xf0] sm:$0xff]  ;;  %v812_v40 = vpack.c.bf16 %v191_v34, %v190_v33 }
  0x33   : > { %831 = vmatpush3.bf16.msra.mxu0 %v828_v12  ;;  %801 = vmatprep.subr.bf16.mxu1 %v800_v16  ;;  %v471_v31 = vld [vmem:[#allocation2 + $0xe0] sm:$0xff]  ;;  %v808_v32 = vpack.c.bf16 %v189_v28, %v188_v27  ;;  %v472_v36 = vld [vmem:[#allocation2 + $0xe8] sm:$0xff]  ;;  %v474_v44 = vld [vmem:[#allocation2 + $0xf8] sm:$0xff] }
  0x34   : > { %833 = vmatprep.subr.bf16.mxu0 %v832_v17  ;;  %v840_v35 = vpack.c.bf16 %v471_v31, %v470_v30  ;;  %v198_v38 = vld [vmem:[%s1000_s6 + $0x9] sm:$0x7f]  ;;  %v844_v41 = vpack.c.bf16 %v473_v37, %v472_v36  ;;  %v192_v42 = vld [vmem:[#allocation2 + $0x20] sm:$0xff]  ;;  %v194_v50 = vld [vmem:[#allocation2 + $0x30] sm:$0xff] }
  0x35   : > { %v373_v39 = vld [vmem:[%s1000_s6 + $0xa] sm:$0x7f]  ;;  %v475_v45 = vld [vmem:[#allocation2 + $0x100] sm:$0xff]  ;;  %v195_v51 = vld [vmem:[#allocation2 + $0x38] sm:$0xff] }
  0x36   : > { %803 = vmatpush3.bf16.msra.mxu1 %v800_v16  ;;  %v193_v43 = vld [vmem:[#allocation2 + $0x28] sm:$0xff]  ;;  %v186_v46 = vld [vmem:[%s1000_s6] sm:$0xff]  ;;  %v848_v49 = vpack.c.bf16 %v475_v45, %v474_v44  ;;  %v477_v53 = vld [vmem:[#allocation2 + $0x110] sm:$0xff]  ;;  %v820_v54 = vpack.c.bf16 %v195_v51, %v194_v50 }
  0x37   : > { %835 = vmatpush3.bf16.msra.mxu0 %v832_v17  ;;  %805 = vmatprep.subr.bf16.mxu1 %v804_v24  ;;  %v467_v47 = vld [vmem:[%s1000_s6 + $0x3] sm:$0xff]  ;;  %v816_v48 = vpack.c.bf16 %v193_v43, %v192_v42  ;;  %v478_v57 = vld [vmem:[#allocation2 + $0x118] sm:$0xff]  ;;  %v468_v59 = vld [vmem:[%s1000_s6 + $0xb] sm:$0x7f] }
  0x38   : > { %837 = vmatprep.subr.bf16.mxu0 %v836_v25  ;;  %v476_v52 = vld [vmem:[#allocation2 + $0x108] sm:$0xff]  ;;  %v196_v56 = vld [vmem:[#allocation2 + $0x40] sm:$0xff] }
  0x39   : > { %v852_v55 = vpack.c.bf16 %v477_v53, %v476_v52  ;;  %v187_v58 = vld [vmem:[%s1000_s6 + $0x8] sm:$0x7f]  ;;  %v660_v62 = vld [vmem:[%s1030_s2] ss:$0 sm:$0xff] }
  0x3a   : > { %807 = vmatpush3.bf16.msra.mxu1 %v804_v24 }
  0x3b   : > { %839 = vmatpush3.bf16.msra.mxu0 %v836_v25  ;;  %724 = vmatprep.subr.mxu1 %v208_v26 }
  0x3c   : > { %766 = vmatprep.subr.mxu0 %v383_v29 }
  0x3e   : > { %725 = vmatpush3.msra.mxu1 %v208_v26 }
  0x3f   : > { %767 = vmatpush3.msra.mxu0 %v383_v29  ;;  %809 = vmatprep.subr.bf16.mxu1 %v808_v32 }
  0x40   : > { %841 = vmatprep.subr.bf16.mxu0 %v840_v35  ;;  %727 = vmatmul.mubr.msk.f32.vlgmr.msra.gmra.mrb[0].mxu1 %vm209_vm0, %v198_v38 }
  0x41   : > { %811 = vmatpush3.bf16.msra.mxu1 %v808_v32  ;;  %769 = vmatmul.mubr.msk.f32.vlgmr.msra.gmra.mrb[0].mxu0 %vm209_vm0, %v373_v39 }
  0x42   : > { %843 = vmatpush3.bf16.msra.mxu0 %v840_v35  ;;  %813 = vmatprep.subr.bf16.mxu1 %v812_v40 }
  0x43   : > { %845 = vmatprep.subr.bf16.mxu0 %v844_v41  ;;  %747 = vmatprep.mubr.msk.f32.mxu1 %vm209_vm0, %v186_v46 }
  0x44   : > { %789 = vmatprep.mubr.msk.f32.mxu0 %vm209_vm0, %v467_v47 }
  0x45   : > { %815 = vmatpush3.bf16.msra.mxu1 %v812_v40 }
  0x46   : > { %847 = vmatpush3.bf16.msra.mxu0 %v844_v41  ;;  %817 = vmatprep.subr.bf16.mxu1 %v816_v48 }
  0x47   : > { %849 = vmatprep.subr.bf16.mxu0 %v848_v49 }
  0x49   : > { %819 = vmatpush3.bf16.msra.mxu1 %v816_v48 }
  0x4a   : > { %851 = vmatpush3.bf16.msra.mxu0 %v848_v49  ;;  %821 = vmatprep.subr.bf16.mxu1 %v820_v54 }
  0x4b   : > { %853 = vmatprep.subr.bf16.mxu0 %v852_v55 }
  0x4d   : > { %823 = vmatpush3.bf16.msra.mxu1 %v820_v54 }
  0x4e   : > { %855 = vmatpush3.bf16.msra.mxu0 %v852_v55  ;;  %745 = vmatprep.subr.mxu1 %v196_v56 }
  0x4f   : > { %787 = vmatprep.subr.mxu0 %v478_v57 }
  0x51   : > { %746 = vmatpush3.msra.mxu1 %v196_v56 }
  0x52   : > { %788 = vmatpush3.msra.mxu0 %v478_v57  ;;  %748 = vmatmul.mubr.msk.f32.vlgmr.msra.gmra.mrb[0].mxu1 %vm209_vm0, %v187_v58 }
  0x53   : > { %790 = vmatmul.mubr.msk.f32.vlgmr.msra.gmra.mrb[0].mxu0 %vm209_vm0, %v468_v59 }
 0x125   : > { %v749_v60 = vpop.f32.mrb[0].mxu1 }
 0x126   : > { %v791_v61 = vpop.f32.mrb[0].mxu0  ;;  %v363_v63 = vpop.f32.mrb[1].mxu1 }
 0x127   : > { %v856_v0 = vadd.f32 %v791_v61, %v749_v60  ;;  %v551_v1 = vpop.f32.mrb[1].mxu0 }
 0x128   : > { %v857_v2 = vadd.f32 %v551_v1, %v363_v63 }
 0x129   : > { %v570_v3 = vadd.f32 %v856_v0, %v660_v62 }
 0x12a   : > { %v569_v4 = vadd.f32 %v857_v2, %v660_v62 }
 0x12b   : > { %574 = vst.msk [vmem:[%s185_s14 + $0x8] sm:$0x7f] %vm573_vm1, %v570_v3 }
 0x12c   : > { %572 = vst.msk [vmem:[%s185_s14] sm:$0xff] %vm571_vm2, %v569_v4 }
 0x12d PF: > { %s14_s12 = sadd.s32 1, %s922_s12  }
 0x12e   : > { %p11_p3 = scmp.ge.s32.totalorder %s14_s12, 4  }
 0x130   :  { %13 = sbr.rel (!%p11_p3) target bundleno = 1 (0x1), region = 70 }
 0x137   :  { %596 = vsyncpa [#allocation3], 1 }
 0x138   :  { %598 = vsyncpa [#allocation3 + $0x1], 1 }

</bundles_post_ra>
